<compile_context>
chip_gen: v7x
topology: tpu7x:2x2x1
jax: 0.10.0
libtpu: 0.0.40
codegen_flags: <defaults>
</compile_context>

<pallas_src>
import functools

import jax
import jax.numpy as jnp
from jax import lax
from jax.experimental import pallas as pl
from jax.experimental.pallas import tpu as pltpu

# Small versions of the module's globals
# (original: batch_size=512, n_heads=4, n_pixels=196, n_states=256)
BATCH = 4
N_HEADS = 4
N_PIXELS = 16
N_STATES = 32

# MXU operand dtype (accumulation is always f32 via preferred_element_type).
MXU_DTYPE = jnp.bfloat16


# ---------------------------------------------------------------------------
# Fused kernel: qkv projection + attention + raw-view merge + out projection
# for a (bb, P, S) batch tile; writes the final (bb, S, P) NCL output.
# ---------------------------------------------------------------------------
def _mha_fused_kernel(x_ref, wqkv_ref, bqkv_ref, wo_ref, bo_ref, o_ref,
                      merged_ref, *, n_heads):
    """x_ref:   (bb, P, S) bf16, pixel rows pre-permuted to g-major order
       wqkv_ref:(S, 3S)    bf16  [Wq^T*scale | Wk^T | Wv^T]
       bqkv_ref:(1, 3S)    f32   [bq*scale | bk | bv]
       wo_ref:  (S, S)     bf16  fc_out weight (row = output channel)
       bo_ref:  (S, 1)     f32
       o_ref:   (bb, S, P) f32   final module layout (no output transpose)
       merged_ref: (P, S)  f32   VMEM scratch for the merged-head activation"""
    bb, P, S = x_ref.shape
    H = n_heads
    Hs = S // H                      # head dim (scale pre-folded in wrapper)
    PH = P // H                      # merged-output rows owned by each head

    bqkv = bqkv_ref[...]             # (1, 3S) tiny, hoisted out of the loop
    bo = bo_ref[...]                 # (S, 1)

    def one_element(i, carry):
        x_i = x_ref[i]                                            # (P, S) bf16
        # Fused Q/K/V projection: x read once, one MXU matmul, f32 accumulate.
        qkv = jnp.dot(x_i, wqkv_ref[...],
                      preferred_element_type=jnp.float32) + bqkv  # (P, 3S) f32

        for h in range(H):                                        # static unroll
            q = qkv[:, h * Hs:(h + 1) * Hs].astype(MXU_DTYPE)
            k = qkv[:, S + h * Hs:S + (h + 1) * Hs].astype(MXU_DTYPE)
            v = qkv[:, 2 * S + h * Hs:2 * S + (h + 1) * Hs].astype(MXU_DTYPE)

            # scores = q @ k.T (contract last dims -> no transpose copy)
            s = lax.dot_general(q, k, (((1,), (1,)), ((), ())),
                                preferred_element_type=jnp.float32)  # (P, P)
            # f32 softmax; exact normalisation applied to the small (P,Hs) out.
            s = s - jnp.max(s, axis=-1, keepdims=True)
            p = jnp.exp(s)
            denom = jnp.sum(p, axis=-1, keepdims=True)               # (P, 1)
            av = jnp.dot(p.astype(MXU_DTYPE), v,
                         preferred_element_type=jnp.float32)         # (P, Hs)
            av = av / denom

            # PyTorch raw-`.view` head merge.  Thanks to the wrapper's g-major
            # pixel permutation, output row-block h / column-block g needs the
            # contiguous slice av[g*PH:(g+1)*PH] (no gathers, no sel-matmuls).
            for g in range(H):
                merged_ref[h * PH:(h + 1) * PH, g * Hs:(g + 1) * Hs] = (
                    av[g * PH:(g + 1) * PH, :])

        # Single K=S out projection computed directly in (state, pixel) layout:
        #   out[s, p] = sum_c wo[s, c] * merged[p, c] + bo[s]
        # so the kernel emits the module's final layout and no transpose is
        # needed in-kernel or in XLA.
        out_i = lax.dot_general(wo_ref[...], merged_ref[...].astype(MXU_DTYPE),
                                (((1,), (1,)), ((), ())),
                                preferred_element_type=jnp.float32)   # (S, P)
        o_ref[i] = out_i + bo
        return carry

    # fori_loop (not a static unroll) bounds live ranges at bb = 8..16.
    lax.fori_loop(0, bb, one_element, 0)


# ---------------------------------------------------------------------------
# Wrapper (matches MultiheadAttention.forward semantics exactly).
# ---------------------------------------------------------------------------
def multihead_attention_forward(x, params, n_heads=N_HEADS):
    """x: (B, n_states, n_pixels) float32 -> (B, n_states, n_pixels) float32."""
    wq, bq, wk, bk, wv, bv, wo, bo = params
    B, S, P = x.shape
    H = n_heads
    assert S % H == 0 and P % H == 0, (S, P, H)
    Hs, PH = S // H, P // H
    scale = 1.0 / (Hs ** 0.5)

    # Pack the three 1x1-conv weights into one (S,3S) bf16 operand; fold the
    # softmax scale into the Q projection (weights AND bias).  Biases stay f32.
    wqkv_t = jnp.concatenate([(wq * scale).T, wk.T, wv.T],
                             axis=1).astype(MXU_DTYPE)            # (S, 3S)
    bqkv = jnp.concatenate([bq * scale, bk, bv]).reshape(1, 3 * S).astype(
        jnp.float32)                                              # (1, 3S)
    wo_m = wo.astype(MXU_DTYPE)                                   # (S, S)
    bo_col = bo.reshape(S, 1).astype(jnp.float32)                 # (S, 1)

    # NCL -> pixel-major with a g-major pixel permutation (p = r'*H+g  ->  row
    # g*PH+r').  The reshapes are metadata-only, so this is ONE fused XLA
    # transpose pass; the bf16 cast halves its HBM traffic.
    x_pm = (x.astype(MXU_DTYPE)
             .reshape(B, S, PH, H)
             .transpose(0, 3, 2, 1)
             .reshape(B, P, S))
    # TODO(synk): fold this remaining input transpose+permute into the kernel
    # (read (bb,S,P) blocks and contract the sublane dim in the QKV matmul).

    # Per-generation tiling: v5e/v6e have 128 MiB VMEM -> bigger batch tiles;
    # v7x (and unknown chips) stay under its 64 MiB / 32 MiB scoped budget and
    # rely on the "parallel" batch axis to feed both TensorCores.
    kind = jax.devices()[0].device_kind.lower()
    if ("v5" in kind) or ("v6" in kind):
        bb_max, vmem_limit = 16, 64 * 1024 * 1024
    else:
        bb_max, vmem_limit = 8, 32 * 1024 * 1024
    bb = max(d for d in range(1, bb_max + 1) if B % d == 0)
    grid = (B // bb,)

    kernel = functools.partial(_mha_fused_kernel, n_heads=H)
    # TODO(synk): on v7x, mark the constant-index weight/bias specs with
    # pipeline_mode=pl.Buffered(1) to reclaim their dead second buffer (~1 MiB).
    # TODO(synk): at production P=196, optionally pad pixels to 224 (with -inf
    # key masking) for clean (8,128) tiling; measure per generation.
    return pl.pallas_call(
        kernel,
        out_shape=jax.ShapeDtypeStruct((B, S, P), jnp.float32),
        grid=grid,
        in_specs=[
            pl.BlockSpec((bb, P, S), lambda i: (i, 0, 0)),   # x (pixel-major)
            pl.BlockSpec((S, 3 * S), lambda i: (0, 0)),      # packed Wqkv
            pl.BlockSpec((1, 3 * S), lambda i: (0, 0)),      # packed bias
            pl.BlockSpec((S, S), lambda i: (0, 0)),          # Wo
            pl.BlockSpec((S, 1), lambda i: (0, 0)),          # bo
        ],
        out_specs=pl.BlockSpec((bb, S, P), lambda i: (i, 0, 0)),
        scratch_shapes=[pltpu.VMEM((P, S), jnp.float32)],
        compiler_params=pltpu.CompilerParams(
            dimension_semantics=("parallel",),               # megacore batch
            vmem_limit_bytes=vmem_limit,
        ),
    )(x_pm, wqkv_t, bqkv, wo_m, bo_col)


# ---------------------------------------------------------------------------
# Pure-JAX reference (direct transcription of the PyTorch module) for checking.
# ---------------------------------------------------------------------------
def reference_forward(x, params, n_heads=N_HEADS):
    wq, bq, wk, bk, wv, bv, wo, bo = params
    B, S, P = x.shape
    H, Hs = n_heads, S // n_heads

    def conv(t, w, b):                                  # 1x1 Conv1d on (B,S,P)
        return jnp.einsum('oi,bip->bop', w, t) + b[None, :, None]

    def split(t):                                       # (B,S,P)->(B,H,P,Hs)
        return jnp.transpose(t.reshape(B, H, Hs, P), (0, 1, 3, 2))

    q = split(conv(x, wq, bq))
    k = split(conv(x, wk, bk))
    v = split(conv(x, wv, bv))
    att = jnp.einsum('bhpd,bhqd->bhpq', q, k) / jnp.sqrt(jnp.float32(Hs))
    att = jax.nn.softmax(att, axis=-1)
    av = jnp.einsum('bhpq,bhqd->bhpd', att, v)          # (B,H,P,Hs)
    # PyTorch's raw `.view` merge (heads NOT transposed back), then transpose.
    merged = jnp.transpose(av.reshape(B, P, S), (0, 2, 1))
    return conv(merged, wo, bo)


if __name__ == "__main__":
    key = jax.random.PRNGKey(0)
    keys = jax.random.split(key, 9)
    S = N_STATES

    def winit(k):
        return jax.random.normal(k, (S, S), jnp.float32) * 0.1

    def binit(k):
        return jax.random.normal(k, (S,), jnp.float32) * 0.1

    params = (
        winit(keys[0]), binit(keys[1]),   # fc_q
        winit(keys[2]), binit(keys[3]),   # fc_k
        winit(keys[4]), binit(keys[5]),   # fc_v
        winit(keys[6]), binit(keys[7]),   # fc_out
    )
    x = jax.random.normal(keys[8], (BATCH, N_STATES, N_PIXELS), jnp.float32)

    fwd = jax.jit(multihead_attention_forward)
    out = jax.block_until_ready(fwd(x, params))

    ref = reference_forward(x, params)
    assert out.shape == (BATCH, N_STATES, N_PIXELS), out.shape
    # Tolerance covers the bf16 MXU operands (softmax/accumulation stay f32);
    # expected deviation vs the f32 reference is ~1e-2 relative.
    err = float(jnp.max(jnp.abs(out - ref)))
    assert jnp.allclose(out, ref, atol=3e-2, rtol=3e-2), err

    print("KERNEL_OK")
</pallas_src>

<mosaic_0001>
module attributes {stable_mosaic.version = 11 : i64} {
  func.func @_mha_fused_kernel(%arg0: i32, %arg1: memref<4x16x32xbf16, #tpu.memory_space<vmem>>, %arg2: memref<32x96xbf16, #tpu.memory_space<vmem>>, %arg3: memref<1x96xf32, #tpu.memory_space<vmem>>, %arg4: memref<32x32xbf16, #tpu.memory_space<vmem>>, %arg5: memref<32x1xf32, #tpu.memory_space<vmem>>, %arg6: memref<4x32x16xf32, #tpu.memory_space<vmem>>, %arg7: memref<16x32xf32, #tpu.memory_space<vmem>>) attributes {dimension_semantics = [#tpu.dimension_semantics<parallel>], iteration_bounds = array<i64: 1>, scalar_prefetch = 0 : i64, scratch_operands = 1 : i64, tpu.core_type = #tpu.core_type<tc>, window_params = [{transform_indices = @transform_0, window_bounds = array<i64: 4, 16, 32>}, {pipeline_mode = #tpu.pipeline_mode<synchronous>, transform_indices = @transform_1, window_bounds = array<i64: 32, 96>}, {pipeline_mode = #tpu.pipeline_mode<synchronous>, transform_indices = @transform_2, window_bounds = array<i64: 1, 96>}, {pipeline_mode = #tpu.pipeline_mode<synchronous>, transform_indices = @transform_3, window_bounds = array<i64: 32, 32>}, {pipeline_mode = #tpu.pipeline_mode<synchronous>, transform_indices = @transform_4, window_bounds = array<i64: 32, 1>}, {transform_indices = @transform_5, window_bounds = array<i64: 4, 32, 16>}]} {
    %c0 = arith.constant 0 : index
    %c0_0 = arith.constant 0 : index
    %0 = vector.load %arg3[%c0, %c0_0] : memref<1x96xf32, #tpu.memory_space<vmem>>, vector<1x96xf32>
    %c0_1 = arith.constant 0 : index
    %c0_2 = arith.constant 0 : index
    %1 = vector.load %arg5[%c0_1, %c0_2] : memref<32x1xf32, #tpu.memory_space<vmem>>, vector<32x1xf32>
    %c0_i32 = arith.constant 0 : i32
    %c4_i32 = arith.constant 4 : i32
    %2 = arith.addi %c0_i32, %c4_i32 : i32
    %c1_i32 = arith.constant 1 : i32
    scf.for %arg8 = %c0_i32 to %2 step %c1_i32  : i32 {
      %3 = arith.index_cast %arg8 : i32 to index
      %c0_4 = arith.constant 0 : index
      %c0_5 = arith.constant 0 : index
      %4 = vector.load %arg1[%3, %c0_4, %c0_5] : memref<4x16x32xbf16, #tpu.memory_space<vmem>>, vector<1x16x32xbf16>
      %5 = vector.shape_cast %4 : vector<1x16x32xbf16> to vector<16x32xbf16>
      %c0_6 = arith.constant 0 : index
      %c0_7 = arith.constant 0 : index
      %6 = vector.load %arg2[%c0_6, %c0_7] : memref<32x96xbf16, #tpu.memory_space<vmem>>, vector<32x96xbf16>
      %cst = arith.constant dense<0.000000e+00> : vector<16x96xf32>
      %7 = tpu.matmul %5, %6, %cst {dimension_numbers = #tpu.dot_dimension_numbers<[1], [0], [0], [1], [0, 0, 1, 1], [], []>} : vector<16x32xbf16>, vector<32x96xbf16>, vector<16x96xf32> -> vector<16x96xf32>
      %8 = vector.broadcast %0 : vector<1x96xf32> to vector<16x96xf32>
      %9 = arith.addf %7, %8 : vector<16x96xf32>
      %10 = vector.extract_strided_slice %9 {offsets = [0, 0], sizes = [16, 8], strides = [1, 1]} : vector<16x96xf32> to vector<16x8xf32>
      %11 = arith.truncf %10 : vector<16x8xf32> to vector<16x8xbf16>
      %12 = vector.extract_strided_slice %9 {offsets = [0, 32], sizes = [16, 8], strides = [1, 1]} : vector<16x96xf32> to vector<16x8xf32>
      %13 = arith.truncf %12 : vector<16x8xf32> to vector<16x8xbf16>
      %14 = vector.extract_strided_slice %9 {offsets = [0, 64], sizes = [16, 8], strides = [1, 1]} : vector<16x96xf32> to vector<16x8xf32>
      %15 = arith.truncf %14 : vector<16x8xf32> to vector<16x8xbf16>
      %cst_8 = arith.constant dense<0.000000e+00> : vector<16x16xf32>
      %16 = tpu.matmul %11, %13, %cst_8 {dimension_numbers = #tpu.dot_dimension_numbers<[1], [1], [0], [0], [0, 0, 1, 0], [], []>} : vector<16x8xbf16>, vector<16x8xbf16>, vector<16x16xf32> -> vector<16x16xf32>
      %cst_9 = arith.constant dense<0xFF800000> : vector<16xf32>
      %17 = vector.multi_reduction <maximumf>, %16, %cst_9 [1] : vector<16x16xf32> to vector<16xf32>
      %18 = vector.shape_cast %17 : vector<16xf32> to vector<16x1xf32>
      %19 = vector.broadcast %18 : vector<16x1xf32> to vector<16x16xf32>
      %20 = arith.subf %16, %19 : vector<16x16xf32>
      %21 = math.exp %20 : vector<16x16xf32>
      %cst_10 = arith.constant dense<0.000000e+00> : vector<16xf32>
      %22 = vector.multi_reduction <add>, %21, %cst_10 [1] : vector<16x16xf32> to vector<16xf32>
      %23 = vector.shape_cast %22 : vector<16xf32> to vector<16x1xf32>
      %24 = arith.truncf %21 : vector<16x16xf32> to vector<16x16xbf16>
      %cst_11 = arith.constant dense<0.000000e+00> : vector<16x8xf32>
      %25 = tpu.matmul %24, %15, %cst_11 {dimension_numbers = #tpu.dot_dimension_numbers<[1], [0], [0], [1], [0, 0, 1, 1], [], []>} : vector<16x16xbf16>, vector<16x8xbf16>, vector<16x8xf32> -> vector<16x8xf32>
      %26 = vector.broadcast %23 : vector<16x1xf32> to vector<16x8xf32>
      %27 = arith.divf %25, %26 : vector<16x8xf32>
      %28 = vector.extract_strided_slice %27 {offsets = [0, 0], sizes = [4, 8], strides = [1, 1]} : vector<16x8xf32> to vector<4x8xf32>
      %c0_12 = arith.constant 0 : index
      %c0_13 = arith.constant 0 : index
      %29 = vector.load %arg7[%c0_12, %c0_13] : memref<16x32xf32, #tpu.memory_space<vmem>>, vector<4x8xf32>
      tpu.vector_store %arg7[%c0_12, %c0_13], %28 {strides = array<i32>} : memref<16x32xf32, #tpu.memory_space<vmem>>, vector<4x8xf32>,
      %30 = vector.extract_strided_slice %27 {offsets = [4, 0], sizes = [4, 8], strides = [1, 1]} : vector<16x8xf32> to vector<4x8xf32>
      %c0_14 = arith.constant 0 : index
      %c8 = arith.constant 8 : index
      %31 = vector.load %arg7[%c0_14, %c8] : memref<16x32xf32, #tpu.memory_space<vmem>>, vector<4x8xf32>
      tpu.vector_store %arg7[%c0_14, %c8], %30 {strides = array<i32>} : memref<16x32xf32, #tpu.memory_space<vmem>>, vector<4x8xf32>,
      %32 = vector.extract_strided_slice %27 {offsets = [8, 0], sizes = [4, 8], strides = [1, 1]} : vector<16x8xf32> to vector<4x8xf32>
      %c0_15 = arith.constant 0 : index
      %c16 = arith.constant 16 : index
      %33 = vector.load %arg7[%c0_15, %c16] : memref<16x32xf32, #tpu.memory_space<vmem>>, vector<4x8xf32>
      tpu.vector_store %arg7[%c0_15, %c16], %32 {strides = array<i32>} : memref<16x32xf32, #tpu.memory_space<vmem>>, vector<4x8xf32>,
      %34 = vector.extract_strided_slice %27 {offsets = [12, 0], sizes = [4, 8], strides = [1, 1]} : vector<16x8xf32> to vector<4x8xf32>
      %c0_16 = arith.constant 0 : index
      %c24 = arith.constant 24 : index
      %35 = vector.load %arg7[%c0_16, %c24] : memref<16x32xf32, #tpu.memory_space<vmem>>, vector<4x8xf32>
      tpu.vector_store %arg7[%c0_16, %c24], %34 {strides = array<i32>} : memref<16x32xf32, #tpu.memory_space<vmem>>, vector<4x8xf32>,
      %36 = vector.extract_strided_slice %9 {offsets = [0, 8], sizes = [16, 8], strides = [1, 1]} : vector<16x96xf32> to vector<16x8xf32>
      %37 = arith.truncf %36 : vector<16x8xf32> to vector<16x8xbf16>
      %38 = vector.extract_strided_slice %9 {offsets = [0, 40], sizes = [16, 8], strides = [1, 1]} : vector<16x96xf32> to vector<16x8xf32>
      %39 = arith.truncf %38 : vector<16x8xf32> to vector<16x8xbf16>
      %40 = vector.extract_strided_slice %9 {offsets = [0, 72], sizes = [16, 8], strides = [1, 1]} : vector<16x96xf32> to vector<16x8xf32>
      %41 = arith.truncf %40 : vector<16x8xf32> to vector<16x8xbf16>
      %cst_17 = arith.constant dense<0.000000e+00> : vector<16x16xf32>
      %42 = tpu.matmul %37, %39, %cst_17 {dimension_numbers = #tpu.dot_dimension_numbers<[1], [1], [0], [0], [0, 0, 1, 0], [], []>} : vector<16x8xbf16>, vector<16x8xbf16>, vector<16x16xf32> -> vector<16x16xf32>
      %cst_18 = arith.constant dense<0xFF800000> : vector<16xf32>
      %43 = vector.multi_reduction <maximumf>, %42, %cst_18 [1] : vector<16x16xf32> to vector<16xf32>
      %44 = vector.shape_cast %43 : vector<16xf32> to vector<16x1xf32>
      %45 = vector.broadcast %44 : vector<16x1xf32> to vector<16x16xf32>
      %46 = arith.subf %42, %45 : vector<16x16xf32>
      %47 = math.exp %46 : vector<16x16xf32>
      %cst_19 = arith.constant dense<0.000000e+00> : vector<16xf32>
      %48 = vector.multi_reduction <add>, %47, %cst_19 [1] : vector<16x16xf32> to vector<16xf32>
      %49 = vector.shape_cast %48 : vector<16xf32> to vector<16x1xf32>
      %50 = arith.truncf %47 : vector<16x16xf32> to vector<16x16xbf16>
      %cst_20 = arith.constant dense<0.000000e+00> : vector<16x8xf32>
      %51 = tpu.matmul %50, %41, %cst_20 {dimension_numbers = #tpu.dot_dimension_numbers<[1], [0], [0], [1], [0, 0, 1, 1], [], []>} : vector<16x16xbf16>, vector<16x8xbf16>, vector<16x8xf32> -> vector<16x8xf32>
      %52 = vector.broadcast %49 : vector<16x1xf32> to vector<16x8xf32>
      %53 = arith.divf %51, %52 : vector<16x8xf32>
      %54 = vector.extract_strided_slice %53 {offsets = [0, 0], sizes = [4, 8], strides = [1, 1]} : vector<16x8xf32> to vector<4x8xf32>
      %c4 = arith.constant 4 : index
      %c0_21 = arith.constant 0 : index
      %55 = vector.load %arg7[%c4, %c0_21] : memref<16x32xf32, #tpu.memory_space<vmem>>, vector<4x8xf32>
      tpu.vector_store %arg7[%c4, %c0_21], %54 {strides = array<i32>} : memref<16x32xf32, #tpu.memory_space<vmem>>, vector<4x8xf32>,
      %56 = vector.extract_strided_slice %53 {offsets = [4, 0], sizes = [4, 8], strides = [1, 1]} : vector<16x8xf32> to vector<4x8xf32>
      %c4_22 = arith.constant 4 : index
      %c8_23 = arith.constant 8 : index
      %57 = vector.load %arg7[%c4_22, %c8_23] : memref<16x32xf32, #tpu.memory_space<vmem>>, vector<4x8xf32>
      tpu.vector_store %arg7[%c4_22, %c8_23], %56 {strides = array<i32>} : memref<16x32xf32, #tpu.memory_space<vmem>>, vector<4x8xf32>,
      %58 = vector.extract_strided_slice %53 {offsets = [8, 0], sizes = [4, 8], strides = [1, 1]} : vector<16x8xf32> to vector<4x8xf32>
      %c4_24 = arith.constant 4 : index
      %c16_25 = arith.constant 16 : index
      %59 = vector.load %arg7[%c4_24, %c16_25] : memref<16x32xf32, #tpu.memory_space<vmem>>, vector<4x8xf32>
      tpu.vector_store %arg7[%c4_24, %c16_25], %58 {strides = array<i32>} : memref<16x32xf32, #tpu.memory_space<vmem>>, vector<4x8xf32>,
      %60 = vector.extract_strided_slice %53 {offsets = [12, 0], sizes = [4, 8], strides = [1, 1]} : vector<16x8xf32> to vector<4x8xf32>
      %c4_26 = arith.constant 4 : index
      %c24_27 = arith.constant 24 : index
      %61 = vector.load %arg7[%c4_26, %c24_27] : memref<16x32xf32, #tpu.memory_space<vmem>>, vector<4x8xf32>
      tpu.vector_store %arg7[%c4_26, %c24_27], %60 {strides = array<i32>} : memref<16x32xf32, #tpu.memory_space<vmem>>, vector<4x8xf32>,
      %62 = vector.extract_strided_slice %9 {offsets = [0, 16], sizes = [16, 8], strides = [1, 1]} : vector<16x96xf32> to vector<16x8xf32>
      %63 = arith.truncf %62 : vector<16x8xf32> to vector<16x8xbf16>
      %64 = vector.extract_strided_slice %9 {offsets = [0, 48], sizes = [16, 8], strides = [1, 1]} : vector<16x96xf32> to vector<16x8xf32>
      %65 = arith.truncf %64 : vector<16x8xf32> to vector<16x8xbf16>
      %66 = vector.extract_strided_slice %9 {offsets = [0, 80], sizes = [16, 8], strides = [1, 1]} : vector<16x96xf32> to vector<16x8xf32>
      %67 = arith.truncf %66 : vector<16x8xf32> to vector<16x8xbf16>
      %cst_28 = arith.constant dense<0.000000e+00> : vector<16x16xf32>
      %68 = tpu.matmul %63, %65, %cst_28 {dimension_numbers = #tpu.dot_dimension_numbers<[1], [1], [0], [0], [0, 0, 1, 0], [], []>} : vector<16x8xbf16>, vector<16x8xbf16>, vector<16x16xf32> -> vector<16x16xf32>
      %cst_29 = arith.constant dense<0xFF800000> : vector<16xf32>
      %69 = vector.multi_reduction <maximumf>, %68, %cst_29 [1] : vector<16x16xf32> to vector<16xf32>
      %70 = vector.shape_cast %69 : vector<16xf32> to vector<16x1xf32>
      %71 = vector.broadcast %70 : vector<16x1xf32> to vector<16x16xf32>
      %72 = arith.subf %68, %71 : vector<16x16xf32>
      %73 = math.exp %72 : vector<16x16xf32>
      %cst_30 = arith.constant dense<0.000000e+00> : vector<16xf32>
      %74 = vector.multi_reduction <add>, %73, %cst_30 [1] : vector<16x16xf32> to vector<16xf32>
      %75 = vector.shape_cast %74 : vector<16xf32> to vector<16x1xf32>
      %76 = arith.truncf %73 : vector<16x16xf32> to vector<16x16xbf16>
      %cst_31 = arith.constant dense<0.000000e+00> : vector<16x8xf32>
      %77 = tpu.matmul %76, %67, %cst_31 {dimension_numbers = #tpu.dot_dimension_numbers<[1], [0], [0], [1], [0, 0, 1, 1], [], []>} : vector<16x16xbf16>, vector<16x8xbf16>, vector<16x8xf32> -> vector<16x8xf32>
      %78 = vector.broadcast %75 : vector<16x1xf32> to vector<16x8xf32>
      %79 = arith.divf %77, %78 : vector<16x8xf32>
      %80 = vector.extract_strided_slice %79 {offsets = [0, 0], sizes = [4, 8], strides = [1, 1]} : vector<16x8xf32> to vector<4x8xf32>
      %c8_32 = arith.constant 8 : index
      %c0_33 = arith.constant 0 : index
      %81 = vector.load %arg7[%c8_32, %c0_33] : memref<16x32xf32, #tpu.memory_space<vmem>>, vector<4x8xf32>
      tpu.vector_store %arg7[%c8_32, %c0_33], %80 {strides = array<i32>} : memref<16x32xf32, #tpu.memory_space<vmem>>, vector<4x8xf32>,
      %82 = vector.extract_strided_slice %79 {offsets = [4, 0], sizes = [4, 8], strides = [1, 1]} : vector<16x8xf32> to vector<4x8xf32>
      %c8_34 = arith.constant 8 : index
      %c8_35 = arith.constant 8 : index
      %83 = vector.load %arg7[%c8_34, %c8_35] : memref<16x32xf32, #tpu.memory_space<vmem>>, vector<4x8xf32>
      tpu.vector_store %arg7[%c8_34, %c8_35], %82 {strides = array<i32>} : memref<16x32xf32, #tpu.memory_space<vmem>>, vector<4x8xf32>,
      %84 = vector.extract_strided_slice %79 {offsets = [8, 0], sizes = [4, 8], strides = [1, 1]} : vector<16x8xf32> to vector<4x8xf32>
      %c8_36 = arith.constant 8 : index
      %c16_37 = arith.constant 16 : index
      %85 = vector.load %arg7[%c8_36, %c16_37] : memref<16x32xf32, #tpu.memory_space<vmem>>, vector<4x8xf32>
      tpu.vector_store %arg7[%c8_36, %c16_37], %84 {strides = array<i32>} : memref<16x32xf32, #tpu.memory_space<vmem>>, vector<4x8xf32>,
      %86 = vector.extract_strided_slice %79 {offsets = [12, 0], sizes = [4, 8], strides = [1, 1]} : vector<16x8xf32> to vector<4x8xf32>
      %c8_38 = arith.constant 8 : index
      %c24_39 = arith.constant 24 : index
      %87 = vector.load %arg7[%c8_38, %c24_39] : memref<16x32xf32, #tpu.memory_space<vmem>>, vector<4x8xf32>
      tpu.vector_store %arg7[%c8_38, %c24_39], %86 {strides = array<i32>} : memref<16x32xf32, #tpu.memory_space<vmem>>, vector<4x8xf32>,
      %88 = vector.extract_strided_slice %9 {offsets = [0, 24], sizes = [16, 8], strides = [1, 1]} : vector<16x96xf32> to vector<16x8xf32>
      %89 = arith.truncf %88 : vector<16x8xf32> to vector<16x8xbf16>
      %90 = vector.extract_strided_slice %9 {offsets = [0, 56], sizes = [16, 8], strides = [1, 1]} : vector<16x96xf32> to vector<16x8xf32>
      %91 = arith.truncf %90 : vector<16x8xf32> to vector<16x8xbf16>
      %92 = vector.extract_strided_slice %9 {offsets = [0, 88], sizes = [16, 8], strides = [1, 1]} : vector<16x96xf32> to vector<16x8xf32>
      %93 = arith.truncf %92 : vector<16x8xf32> to vector<16x8xbf16>
      %cst_40 = arith.constant dense<0.000000e+00> : vector<16x16xf32>
      %94 = tpu.matmul %89, %91, %cst_40 {dimension_numbers = #tpu.dot_dimension_numbers<[1], [1], [0], [0], [0, 0, 1, 0], [], []>} : vector<16x8xbf16>, vector<16x8xbf16>, vector<16x16xf32> -> vector<16x16xf32>
      %cst_41 = arith.constant dense<0xFF800000> : vector<16xf32>
      %95 = vector.multi_reduction <maximumf>, %94, %cst_41 [1] : vector<16x16xf32> to vector<16xf32>
      %96 = vector.shape_cast %95 : vector<16xf32> to vector<16x1xf32>
      %97 = vector.broadcast %96 : vector<16x1xf32> to vector<16x16xf32>
      %98 = arith.subf %94, %97 : vector<16x16xf32>
      %99 = math.exp %98 : vector<16x16xf32>
      %cst_42 = arith.constant dense<0.000000e+00> : vector<16xf32>
      %100 = vector.multi_reduction <add>, %99, %cst_42 [1] : vector<16x16xf32> to vector<16xf32>
      %101 = vector.shape_cast %100 : vector<16xf32> to vector<16x1xf32>
      %102 = arith.truncf %99 : vector<16x16xf32> to vector<16x16xbf16>
      %cst_43 = arith.constant dense<0.000000e+00> : vector<16x8xf32>
      %103 = tpu.matmul %102, %93, %cst_43 {dimension_numbers = #tpu.dot_dimension_numbers<[1], [0], [0], [1], [0, 0, 1, 1], [], []>} : vector<16x16xbf16>, vector<16x8xbf16>, vector<16x8xf32> -> vector<16x8xf32>
      %104 = vector.broadcast %101 : vector<16x1xf32> to vector<16x8xf32>
      %105 = arith.divf %103, %104 : vector<16x8xf32>
      %106 = vector.extract_strided_slice %105 {offsets = [0, 0], sizes = [4, 8], strides = [1, 1]} : vector<16x8xf32> to vector<4x8xf32>
      %c12 = arith.constant 12 : index
      %c0_44 = arith.constant 0 : index
      %107 = vector.load %arg7[%c12, %c0_44] : memref<16x32xf32, #tpu.memory_space<vmem>>, vector<4x8xf32>
      tpu.vector_store %arg7[%c12, %c0_44], %106 {strides = array<i32>} : memref<16x32xf32, #tpu.memory_space<vmem>>, vector<4x8xf32>,
      %108 = vector.extract_strided_slice %105 {offsets = [4, 0], sizes = [4, 8], strides = [1, 1]} : vector<16x8xf32> to vector<4x8xf32>
      %c12_45 = arith.constant 12 : index
      %c8_46 = arith.constant 8 : index
      %109 = vector.load %arg7[%c12_45, %c8_46] : memref<16x32xf32, #tpu.memory_space<vmem>>, vector<4x8xf32>
      tpu.vector_store %arg7[%c12_45, %c8_46], %108 {strides = array<i32>} : memref<16x32xf32, #tpu.memory_space<vmem>>, vector<4x8xf32>,
      %110 = vector.extract_strided_slice %105 {offsets = [8, 0], sizes = [4, 8], strides = [1, 1]} : vector<16x8xf32> to vector<4x8xf32>
      %c12_47 = arith.constant 12 : index
      %c16_48 = arith.constant 16 : index
      %111 = vector.load %arg7[%c12_47, %c16_48] : memref<16x32xf32, #tpu.memory_space<vmem>>, vector<4x8xf32>
      tpu.vector_store %arg7[%c12_47, %c16_48], %110 {strides = array<i32>} : memref<16x32xf32, #tpu.memory_space<vmem>>, vector<4x8xf32>,
      %112 = vector.extract_strided_slice %105 {offsets = [12, 0], sizes = [4, 8], strides = [1, 1]} : vector<16x8xf32> to vector<4x8xf32>
      %c12_49 = arith.constant 12 : index
      %c24_50 = arith.constant 24 : index
      %113 = vector.load %arg7[%c12_49, %c24_50] : memref<16x32xf32, #tpu.memory_space<vmem>>, vector<4x8xf32>
      tpu.vector_store %arg7[%c12_49, %c24_50], %112 {strides = array<i32>} : memref<16x32xf32, #tpu.memory_space<vmem>>, vector<4x8xf32>,
      %c0_51 = arith.constant 0 : index
      %c0_52 = arith.constant 0 : index
      %114 = vector.load %arg4[%c0_51, %c0_52] : memref<32x32xbf16, #tpu.memory_space<vmem>>, vector<32x32xbf16>
      %c0_53 = arith.constant 0 : index
      %c0_54 = arith.constant 0 : index
      %115 = vector.load %arg7[%c0_53, %c0_54] : memref<16x32xf32, #tpu.memory_space<vmem>>, vector<16x32xf32>
      %116 = arith.truncf %115 : vector<16x32xf32> to vector<16x32xbf16>
      %cst_55 = arith.constant dense<0.000000e+00> : vector<32x16xf32>
      %117 = tpu.matmul %114, %116, %cst_55 {dimension_numbers = #tpu.dot_dimension_numbers<[1], [1], [0], [0], [0, 0, 1, 0], [], []>} : vector<32x32xbf16>, vector<16x32xbf16>, vector<32x16xf32> -> vector<32x16xf32>
      %118 = vector.broadcast %1 : vector<32x1xf32> to vector<32x16xf32>
      %119 = arith.addf %117, %118 : vector<32x16xf32>
      %120 = arith.index_cast %arg8 : i32 to index
      %c0_56 = arith.constant 0 : index
      %c0_57 = arith.constant 0 : index
      %121 = vector.load %arg6[%120, %c0_56, %c0_57] : memref<4x32x16xf32, #tpu.memory_space<vmem>>, vector<1x32x16xf32>
      %122 = vector.shape_cast %121 : vector<1x32x16xf32> to vector<32x16xf32>
      %123 = vector.shape_cast %119 : vector<32x16xf32> to vector<1x32x16xf32>
      tpu.vector_store %arg6[%120, %c0_56, %c0_57], %123 {strides = array<i32>} : memref<4x32x16xf32, #tpu.memory_space<vmem>>, vector<1x32x16xf32>,
    }
    %c4_i32_3 = arith.constant 4 : i32
    return
  }
  func.func @transform_0(%arg0: i32) -> (i32, i32, i32) {
    %c0_i32 = arith.constant 0 : i32
    %c0_i32_0 = arith.constant 0 : i32
    %c0_i32_1 = arith.constant 0 : i32
    return %arg0, %c0_i32, %c0_i32_0 : i32, i32, i32
  }
  func.func @transform_1(%arg0: i32) -> (i32, i32) {
    %c0_i32 = arith.constant 0 : i32
    %c0_i32_0 = arith.constant 0 : i32
    %c0_i32_1 = arith.constant 0 : i32
    return %c0_i32, %c0_i32_0 : i32, i32
  }
  func.func @transform_2(%arg0: i32) -> (i32, i32) {
    %c0_i32 = arith.constant 0 : i32
    %c0_i32_0 = arith.constant 0 : i32
    %c0_i32_1 = arith.constant 0 : i32
    return %c0_i32, %c0_i32_0 : i32, i32
  }
  func.func @transform_3(%arg0: i32) -> (i32, i32) {
    %c0_i32 = arith.constant 0 : i32
    %c0_i32_0 = arith.constant 0 : i32
    %c0_i32_1 = arith.constant 0 : i32
    return %c0_i32, %c0_i32_0 : i32, i32
  }
  func.func @transform_4(%arg0: i32) -> (i32, i32) {
    %c0_i32 = arith.constant 0 : i32
    %c0_i32_0 = arith.constant 0 : i32
    %c0_i32_1 = arith.constant 0 : i32
    return %c0_i32, %c0_i32_0 : i32, i32
  }
  func.func @transform_5(%arg0: i32) -> (i32, i32, i32) {
    %c0_i32 = arith.constant 0 : i32
    %c0_i32_0 = arith.constant 0 : i32
    %c0_i32_1 = arith.constant 0 : i32
    return %arg0, %c0_i32, %c0_i32_0 : i32, i32, i32
  }
}

</mosaic_0001>

<bundles_post_ra>
// kernel: multihead_attention_forward.1
= control target key start
LH: loop header
LB: loop body
LE: loop exit
PB: predicated region body
PF: predicated region fallthrough
CT: control target
= control target key end

     0   :  { %s1176_s0 = inlined_call_operand.vmem [shape: bf16[4,16,32], index: 0, kind: input, shape index: {}]   ;;  %s1177_s1 = inlined_call_operand.vmem [shape: bf16[32,96], index: 1, kind: input, shape index: {}]   ;;  %s1178_s2 = inlined_call_operand.vmem [shape: f32[1,96], index: 2, kind: input, shape index: {}]   ;;  %s1179_s3 = inlined_call_operand.vmem [shape: bf16[32,32], index: 3, kind: input, shape index: {}]   ;;  %s1180_s4 = inlined_call_operand.vmem [shape: f32[32,1], index: 4, kind: input, shape index: {}]   ;;  %s1181_s5 = inlined_call_operand.vmem [shape: f32[4,32,16], index: 5, kind: output, shape index: {}]  }
   0x1   :  { %v1001_v0 = vld [vmem:[%s1178_s2] ss:$0 sm:$0xff]  ;;  %v1011_v2 = vld [vmem:[%s1180_s4 + $0x8] sm:$0xff]  ;;  %v1016_v3 = vld [vmem:[%s1180_s4 + $0x10] sm:$0xff]  ;;  %s1023_s2 = smov 0  }
   0x2   :  { %v1006_v1 = vld [vmem:[%s1180_s4] sm:$0xff]  ;;  %v1021_v4 = vld [vmem:[%s1180_s4 + $0x18] sm:$0xff] }
   0x3 LB: > { %v906_v5 = vld [vmem:[%s1177_s1] sm:$0xff]   ;;  %v951_v6 = vmov 0.0   ;;  %v907_v7 = vld [vmem:[%s1177_s1 + $0x8] sm:$0xff]   ;;  %vm952_vm0 = vmmov 0   ;;  %s793_s6 = sshll.u32 %s949_s2, 3  ;;  %vm64_vm1 = vcmask 261120   ;;  %s949_s2 = sphi %s1023_s2, %s31_s2  }
   0x4   : > { %816 = vmatprep.subr.bf16.mxu0 %v951_v6  ;;  %824 = vmatprep.subr.bf16.mxu1 %v951_v6  ;;  %s34_s9 = scalar_lea.vmem %s1176_s0, %s793_s6  ;;  %s953_s10 = smov 120   ;;  %vm113_vm2 = vcmask 64512   ;;  %vm161_vm3 = vcmask 130048   ;;  %vm232_vm4 = vcmask 60416   ;;  %vm238_vm5 = vcmask 130116  }
   0x5   : > { %817 = vmatpush3.bf16.msra.mxu0 %v906_v5  ;;  %820 = vmatprep.mubr.msk.bf16.mxu0 %vm952_vm0, %v951_v6  ;;  %v908_v8 = vld [vmem:[%s34_s9] sm:$0xff]   ;;  %s954_s11 = smov 96   ;;  %s955_s12 = smov 80   ;;  %vm244_vm6 = vcmask 191616   ;;  %vm249_vm7 = vcmask 261316  }
   0x6   : > { %818 = vmatprep.subr.bf16.mxu0 %v951_v6  ;;  %826 = vmatprep.mubr.msk.bf16.mxu1 %vm952_vm0, %v951_v6  ;;  %s956_s13 = smov 88   ;;  %s957_s14 = smov 72  }
   0x7   : > { %s958_s15 = smov 112   ;;  %s959_s16 = smov 104  }
   0x8   : > { %s960_s17 = smov 56   ;;  %s961_s18 = smov 64  }
   0x9   : > { %819 = vmatpush3.bf16.msra.mxu0 %v907_v7  ;;  %s962_s19 = smov 48   ;;  %s963_s20 = smov 40  }
   0xa   : > { %830 = vmatprep.subr.bf16.mxu0 %v951_v6  ;;  %s964_s21 = smov 8   ;;  %s965_s22 = smov 16  }
   0xb   : > { %s966_s23 = smov 24   ;;  %s792_s28 = sshll.u32 %s949_s2, 5 }
   0xc   : > { %821 = vmatmul.mubr.msk.bf16.vlgmr.msra.gmra.mrb[0].mxu0 %vm64_vm1, %v908_v8  ;;  %s755_s30 = scalar_lea.vmem %s1181_s5, %s792_s28  ;;  %s31_s2 = sadd.s32 1, %s949_s2  }
   0xd   : > { %832 = vmatprep.mubr.msk.bf16.mxu0 %vm952_vm0, %v951_v6  ;;  %p28_p0 = scmp.ge.s32.totalorder %s31_s2, 4  }
  0xdf   : > { %v102_v9 = vpop.f32.mrb[0].mxu0 }
  0xe0   : > { %v822_v10 = vpop.f32.mrb[1].mxu0  ;;  %v103_v12 = vadd.f32 %v1001_v0, %v102_v9 }
  0xe1   : > { %v105_v11 = vpop.f32.mrb[2].mxu0 }
  0xe2   : > { %v106_v13 = vadd.f32 %v1001_v0, %v105_v11  ;;  %v823_v14 = vpop.f32.mrb[3].mxu0 }
  0xe4   : > { %v1051_v15 = vpack.c.bf16 %v106_v13, %v103_v12 }
  0xe6   : > { %251 = vrot.lane.b32.xlu1 %v1051_v15, %s953_s10  ;;  %111 = vrot.lane.b32.xlu0 %v1051_v15, %s954_s11 }
  0xea   : > { %389 = vrot.lane.b32.xlu1 %v1051_v15, %s955_s12  ;;  %253 = vrot.lane.b32.xlu0 %v1051_v15, %s956_s13 }
  0xee   : > { %525 = vrot.lane.b32.xlu1 %v1051_v15, %s957_s14  ;;  %387 = vrot.lane.b32.xlu0 %v1051_v15, %s958_s15 }
  0xf2   : > { %523 = vrot.lane.b32.xlu0 %v1051_v15, %s959_s16 }
 0x158   : > { %v112_v16 = vpop.permute.xlu0 %111  ;;  %v252_v19 = vpop.permute.xlu1 %251 }
 0x159   : > { %v118_v17 = vsel %vm113_vm2, %v112_v16, 0 }
 0x15a   : > { %825 = vmatpush3.bf16.xpose.msra.mxu1 %v118_v17 }
 0x15b   : > { %836 = vmatprep.subr.bf16.mxu1 %v951_v6 }
 0x15c   : > { %v254_v18 = vpop.permute.xlu0 %253  ;;  %v390_v21 = vpop.permute.xlu1 %389 }
 0x15d   : > { %v259_v20 = vsel %vm113_vm2, %v254_v18, 0  ;;  %v395_v22 = vsel %vm113_vm2, %v390_v21, 0 }
 0x160   : > { %v526_v23 = vpop.permute.xlu1 %525  ;;  %v388_v24 = vpop.permute.xlu0 %387 }
 0x161   : > { %827 = vmatmul.mubr.msk.bf16.vlgmr.msra.gmra.mrb[0].mxu1 %vm113_vm2, %v1051_v15  ;;  %v531_v25 = vsel %vm113_vm2, %v526_v23, 0 }
 0x162   : > { %837 = vmatpush3.bf16.xpose.msra.mxu1 %v259_v20  ;;  %838 = vmatprep.mubr.msk.bf16.mxu1 %vm952_vm0, %v951_v6 }
 0x163   : > { %848 = vmatprep.subr.bf16.mxu1 %v951_v6 }
 0x164   : > { %v524_v26 = vpop.permute.xlu0 %523 }
 0x169   : > { %839 = vmatmul.mubr.msk.bf16.vlgmr.msra.gmra.mrb[4].mxu1 %vm113_vm2, %v252_v19 }
 0x16a   : > { %849 = vmatpush3.bf16.xpose.msra.mxu1 %v395_v22  ;;  %850 = vmatprep.mubr.msk.bf16.mxu1 %vm952_vm0, %v951_v6 }
 0x16b   : > { %860 = vmatprep.subr.bf16.mxu1 %v951_v6 }
 0x171   : > { %851 = vmatmul.mubr.msk.bf16.vlgmr.msra.gmra.mrb[8].mxu1 %vm113_vm2, %v388_v24 }
 0x172   : > { %861 = vmatpush3.bf16.xpose.msra.mxu1 %v531_v25  ;;  %862 = vmatprep.mubr.msk.bf16.mxu1 %vm952_vm0, %v951_v6 }
 0x179   : > { %863 = vmatmul.mubr.msk.bf16.vlgmr.msra.gmra.mrb[12].mxu1 %vm113_vm2, %v524_v26 }
 0x234   : > { %v154_v27 = vpop.f32.mrb[0].mxu1 }
 0x235   : > { %v828_v28 = vpop.f32.mrb[1].mxu1  ;;  %v162_v29 = vsel %vm161_vm3, %v154_v27, -inf }
 0x236   : > { %163 = vmax.xlane.f32.xlu1 %v162_v29  ;;  %v157_v30 = vpop.f32.mrb[2].mxu1 }
 0x237   : > { %v829_v31 = vpop.f32.mrb[3].mxu1  ;;  %v165_v32 = vsel %vm161_vm3, %v157_v30, -inf }
 0x238   : > { %166 = vmax.xlane.f32.xlu0 %v165_v32 }
 0x23c   : > { %v295_v33 = vpop.f32.mrb[4].mxu1 }
 0x23d   : > { %v840_v34 = vpop.f32.mrb[5].mxu1  ;;  %v302_v35 = vsel %vm161_vm3, %v295_v33, -inf }
 0x23e   : > { %303 = vmax.xlane.f32.xlu0 %v302_v35  ;;  %v298_v36 = vpop.f32.mrb[6].mxu1 }
 0x23f   : > { %v841_v37 = vpop.f32.mrb[7].mxu1  ;;  %v305_v38 = vsel %vm161_vm3, %v298_v36, -inf }
 0x240   : > { %306 = vmax.xlane.f32.xlu1 %v305_v38 }
 0x244   : > { %v431_v39 = vpop.f32.mrb[8].mxu1 }
 0x245   : > { %v852_v40 = vpop.f32.mrb[9].mxu1  ;;  %v438_v41 = vsel %vm161_vm3, %v431_v39, -inf }
 0x246   : > { %439 = vmax.xlane.f32.xlu0 %v438_v41  ;;  %v1083_v42 = vpop.f32.mrb[10].mxu1 }
 0x247   : > { %v853_v43 = vpop.f32.mrb[11].mxu1  ;;  %v441_v48 = vsel %vm161_vm3, %v1083_v42, -inf }
 0x24c   : > { %v1085_v44 = vpop.f32.mrb[12].mxu1 }
 0x24d   : > { %v864_v45 = vpop.f32.mrb[13].mxu1  ;;  %v574_v50 = vsel %vm161_vm3, %v1085_v44, -inf }
 0x24e   : > { %v1087_v46 = vpop.f32.mrb[14].mxu1 }
 0x24f   : > { %v865_v47 = vpop.f32.mrb[15].mxu1  ;;  %v577_v49 = vsel %vm161_vm3, %v1087_v46, -inf }
 0x251   : > { %321 = vrot.lane.b32.xlu1 %v1051_v15, %s960_s17 }
 0x25c   : > { %181 = vrot.lane.b32.xlu0 %v1051_v15, %s961_s18 }
 0x275   : > { %442 = vmax.xlane.f32.xlu1 %v441_v48 }
 0x279   : > { %578 = vmax.xlane.f32.xlu1 %v577_v49 }
 0x27b   : > { %575 = vmax.xlane.f32.xlu0 %v574_v50 }
 0x28a   : > { %457 = vrot.lane.b32.xlu1 %v1051_v15, %s962_s19 }
 0x291   : > { %593 = vrot.lane.b32.xlu0 %v1051_v15, %s963_s20 }
 0x2c3   : > { %v164_v51 = vpop.xlane.xlu1 %163 }
 0x2c4   : > { %v168_v52 = vsub.f32 %v154_v27, %v164_v51 }
 0x2c5   : > { %v167_v53 = vpop.xlane.xlu0 %166 }
 0x2c6   : > { %v170_v54 = vmul.f32 1.442695, %v168_v52  ;;  %v169_v55 = vsub.f32 %v157_v30, %v167_v53 }
 0x2c8   : > { %911 = vpow2.f32 %v170_v54  ;;  %v172_v56 = vmul.f32 1.442695, %v169_v55 }
 0x2ca   : > { %913 = vpow2.f32 %v172_v56 }
 0x2cb   : > { %v304_v57 = vpop.xlane.xlu0 %303 }
 0x2cc   : > { %v308_v58 = vsub.f32 %v295_v33, %v304_v57 }
 0x2cd   : > { %v307_v59 = vpop.xlane.xlu1 %306 }
 0x2ce   : > { %v310_v60 = vmul.f32 1.442695, %v308_v58  ;;  %v309_v61 = vsub.f32 %v298_v36, %v307_v59 }
 0x2d0   : > { %915 = vpow2.f32 %v310_v60  ;;  %v312_v62 = vmul.f32 1.442695, %v309_v61 }
 0x2d1   : > { %v322_v15 = vpop.permute.xlu1 %321 }
 0x2d2   : > { %v912_v63 = vpop.eup %911  ;;  %917 = vpow2.f32 %v312_v62 }
 0x2d3   : > { %v440_v5 = vpop.xlane.xlu0 %439  ;;  %v174_v7 = vsel %vm161_vm3, %v912_v63, 0.0 }
 0x2d4   : > { %v914_v8 = vpop.eup %913  ;;  %v444_v9 = vsub.f32 %v431_v39, %v440_v5  ;;  %175 = vadd.xlane.f32.xlu1 %v174_v7 }
 0x2d5   : > { %v177_v10 = vsel %vm161_vm3, %v914_v8, 0.0  ;;  %v180_v11 = vpack.c.bf16 %v914_v8, %v912_v63 }
 0x2d6   : > { %v446_v12 = vmul.f32 1.442695, %v444_v9  ;;  %178 = vadd.xlane.f32.xlu0 %v177_v10 }
 0x2d7   : > { %v182_v13 = vpop.permute.xlu0 %181 }
 0x2d8   : > { %919 = vpow2.f32 %v446_v12  ;;  %831 = vmatpush3.bf16.msra.mxu0 %v182_v13 }
 0x2d9   : > { %842 = vmatprep.subr.bf16.mxu0 %v951_v6 }
 0x2da   : > { %v916_v14 = vpop.eup %915 }
 0x2db   : > { %833 = vmatmul.mubr.msk.bf16.vlgmr.msra.gmra.mrb[4].mxu0 %vm161_vm3, %v180_v11  ;;  %v314_v16 = vsel %vm161_vm3, %v916_v14, 0.0 }
 0x2dc   : > { %v918_v17 = vpop.eup %917  ;;  %315 = vadd.xlane.f32.xlu0 %v314_v16  ;;  %843 = vmatpush3.bf16.msra.mxu0 %v322_v15 }
 0x2dd   : > { %v317_v18 = vsel %vm161_vm3, %v918_v17, 0.0  ;;  %844 = vmatprep.mubr.msk.bf16.mxu0 %vm952_vm0, %v951_v6  ;;  %v320_v19 = vpack.c.bf16 %v918_v17, %v916_v14  ;;  %854 = vmatprep.subr.bf16.mxu0 %v951_v6 }
 0x2de   : > { %318 = vadd.xlane.f32.xlu1 %v317_v18 }
 0x2e2   : > { %v920_v20 = vpop.eup %919 }
 0x2e3   : > { %845 = vmatmul.mubr.msk.bf16.vlgmr.msra.gmra.mrb[8].mxu0 %vm161_vm3, %v320_v19  ;;  %v450_v21 = vsel %vm161_vm3, %v920_v20, 0.0 }
 0x2e4   : > { %451 = vadd.xlane.f32.xlu0 %v450_v21  ;;  %856 = vmatprep.mubr.msk.bf16.mxu0 %vm952_vm0, %v951_v6 }
 0x302   : > { %v443_v22 = vpop.xlane.xlu1 %442 }
 0x303   : > { %v445_v23 = vsub.f32 %v1083_v42, %v443_v22  ;;  %v909_v22 = vld [vmem:[%s1179_s3] sm:$0xff]  }
 0x304   : > { %874 = vmatprep.mubr.msk.bf16.mxu1 %vm64_vm1, %v909_v22 }
 0x305   : > { %v448_v24 = vmul.f32 1.442695, %v445_v23  ;;  %v967_v23 = vmov 0  }
 0x306   : > { %v579_v25 = vpop.xlane.xlu1 %578  ;;  %904 = vset.pattern.permute.xlu1 %v967_v23  ;;  %905 = vset.pattern.permute.xlu0 %v967_v23 }
 0x307   : > { %921 = vpow2.f32 %v448_v24  ;;  %v581_v26 = vsub.f32 %v1087_v46, %v579_v25 }
 0x308   : > { %v576_v27 = vpop.xlane.xlu0 %575 }
 0x309   : > { %v584_v28 = vmul.f32 1.442695, %v581_v26  ;;  %v580_v29 = vsub.f32 %v1085_v44, %v576_v27 }
 0x30a   : > { %v458_v30 = vpop.permute.xlu1 %457 }
 0x30b   : > { %v582_v31 = vmul.f32 1.442695, %v580_v29  ;;  %855 = vmatpush3.bf16.msra.mxu0 %v458_v30  ;;  %923 = vpow2.f32 %v584_v28 }
 0x30c   : > { %866 = vmatprep.subr.bf16.mxu0 %v951_v6  ;;  %v594_v35 = vpop.permute.xlu0 %593 }
 0x30d   : > { %925 = vpow2.f32 %v582_v31 }
 0x311   : > { %v922_v32 = vpop.eup %921 }
 0x312   : > { %v453_v33 = vsel %vm161_vm3, %v922_v32, 0.0  ;;  %v456_v34 = vpack.c.bf16 %v922_v32, %v920_v20 }
 0x313   : > { %454 = vadd.xlane.f32.xlu0 %v453_v33 }
 0x314   : > { %857 = vmatmul.mubr.msk.bf16.vlgmr.msra.gmra.mrb[12].mxu0 %vm161_vm3, %v456_v34 }
 0x315   : > { %867 = vmatpush3.bf16.msra.mxu0 %v594_v35  ;;  %868 = vmatprep.mubr.msk.bf16.mxu0 %vm952_vm0, %v951_v6  ;;  %v924_v36 = vpop.eup %923 }
 0x316   : > { %v589_v40 = vsel %vm161_vm3, %v924_v36, 0.0 }
 0x317   : > { %v926_v37 = vpop.eup %925 }
 0x318   : > { %v586_v38 = vsel %vm161_vm3, %v926_v37, 0.0  ;;  %v592_v39 = vpack.c.bf16 %v924_v36, %v926_v37 }
 0x319   : > { %587 = vadd.xlane.f32.xlu1 %v586_v38 }
 0x31c   : > { %869 = vmatmul.mubr.msk.bf16.vlgmr.msra.gmra.mrb[16].mxu0 %vm161_vm3, %v592_v39 }
 0x31d   : > { %590 = vadd.xlane.f32.xlu1 %v589_v40  ;;  %v910_v40 = vld [vmem:[%s1179_s3 + $0x8] sm:$0xff]  }
 0x361   : > { %v176_v41 = vpop.xlane.xlu1 %175 }
 0x362   : > { %927 = vrcp.f32 %v176_v41 }
 0x363   : > { %v179_v42 = vpop.xlane.xlu0 %178 }
 0x364   : > { %929 = vrcp.f32 %v179_v42 }
 0x369   : > { %v316_v43 = vpop.xlane.xlu0 %315 }
 0x36a   : > { %931 = vrcp.f32 %v316_v43 }
 0x36b   : > { %v319_v44 = vpop.xlane.xlu1 %318 }
 0x36c   : > { %v928_v45 = vpop.eup %927  ;;  %933 = vrcp.f32 %v319_v44 }
 0x36e   : > { %v930_v48 = vpop.eup %929 }
 0x371   : > { %v452_v60 = vpop.xlane.xlu0 %451 }
 0x372   : > { %935 = vrcp.f32 %v452_v60 }
 0x374   : > { %v932_v52 = vpop.eup %931 }
 0x376   : > { %v934_v56 = vpop.eup %933 }
 0x37c   : > { %v936_v5 = vpop.eup %935 }
 0x3a0   : > { %v455_v61 = vpop.xlane.xlu0 %454 }
 0x3a1   : > { %937 = vrcp.f32 %v455_v61 }
 0x3a6   : > { %v588_v62 = vpop.xlane.xlu1 %587 }
 0x3a7   : > { %939 = vrcp.f32 %v588_v62 }
 0x3aa   : > { %v591_v63 = vpop.xlane.xlu1 %590 }
 0x3ab   : > { %941 = vrcp.f32 %v591_v63  ;;  %v938_v12 = vpop.eup %937 }
 0x3ae   : > { %v221_v6 = vpop.f32.mrb[4].mxu0 }
 0x3af   : > { %v229_v46 = vmul.f32 %v928_v45, %v221_v6  ;;  %v834_v47 = vpop.f32.mrb[5].mxu0 }
 0x3b0   : > { %v224_v49 = vpop.f32.mrb[6].mxu0 }
 0x3b1   : > { %233 = vst.msk [vmem:[#allocation2] sm:$0xf] %vm232_vm4, %v229_v46  ;;  %v231_v50 = vmul.f32 %v930_v48, %v224_v49  ;;  %235 = vrot.lane.b32.xlu0 %v229_v46, %s964_s21  ;;  %v835_v51 = vpop.f32.mrb[7].mxu0  ;;  %v940_v14 = vpop.eup %939 }
 0x3b3   : > { %241 = vrot.lane.b32.xlu1 %v231_v50, %s965_s22 }
 0x3b5   : > { %v942_v20 = vpop.eup %941 }
 0x3b6   : > { %v361_v53 = vpop.f32.mrb[8].mxu0 }
 0x3b7   : > { %v369_v54 = vmul.f32 %v932_v52, %v361_v53  ;;  %246 = vrot.lane.b32.xlu1 %v231_v50, %s966_s23  ;;  %v846_v55 = vpop.f32.mrb[9].mxu0 }
 0x3b8   : > { %v364_v57 = vpop.f32.mrb[10].mxu0 }
 0x3b9   : > { %372 = vst.msk [vmem:[#allocation2 + $0x4] sm:$0xf] %vm232_vm4, %v369_v54  ;;  %v371_v58 = vmul.f32 %v934_v56, %v364_v57  ;;  %v847_v59 = vpop.f32.mrb[11].mxu0 }
 0x3bb   : > { %374 = vrot.lane.b32.xlu1 %v369_v54, %s964_s21  ;;  %379 = vrot.lane.b32.xlu0 %v371_v58, %s965_s22 }
 0x3bf   : > { %383 = vrot.lane.b32.xlu0 %v371_v58, %s966_s23 }
 0x3e7   : > { %v497_v7 = vpop.f32.mrb[12].mxu0 }
 0x3e8   : > { %v505_v8 = vmul.f32 %v936_v5, %v497_v7  ;;  %v858_v9 = vpop.f32.mrb[13].mxu0 }
 0x3e9   : > { %v500_v10 = vpop.f32.mrb[14].mxu0 }
 0x3ea   : > { %508 = vst.msk [vmem:[#allocation2 + $0x8] sm:$0xf] %vm232_vm4, %v505_v8  ;;  %510 = vrot.lane.b32.xlu1 %v505_v8, %s964_s21  ;;  %v859_v11 = vpop.f32.mrb[15].mxu0  ;;  %v507_v13 = vmul.f32 %v938_v12, %v500_v10 }
 0x3ee   : > { %515 = vrot.lane.b32.xlu1 %v507_v13, %s965_s22 }
 0x3ef   : > { %v633_v15 = vpop.f32.mrb[16].mxu0 }
 0x3f0   : > { %v641_v16 = vmul.f32 %v940_v14, %v633_v15  ;;  %v870_v17 = vpop.f32.mrb[17].mxu0 }
 0x3f1   : > { %v636_v18 = vpop.f32.mrb[18].mxu0 }
 0x3f2   : > { %644 = vst.msk [vmem:[#allocation2 + $0xc] sm:$0xf] %vm232_vm4, %v641_v16  ;;  %519 = vrot.lane.b32.xlu1 %v507_v13, %s966_s23  ;;  %646 = vrot.lane.b32.xlu0 %v641_v16, %s964_s21  ;;  %v871_v19 = vpop.f32.mrb[19].mxu0  ;;  %v643_v21 = vmul.f32 %v942_v20, %v636_v18 }
 0x3f6   : > { %651 = vrot.lane.b32.xlu0 %v643_v21, %s965_s22  ;;  %668 = vperm.xlu1 %904, %v1006_v1  }
 0x3fa   : > { %655 = vrot.lane.b32.xlu0 %v643_v21, %s966_s23  ;;  %678 = vperm.xlu1 %904, %v1016_v3  }
 0x3fe   : > { %673 = vperm.xlu0 %905, %v1011_v2   ;;  %683 = vperm.xlu1 %904, %v1021_v4  }
 0x423   : > { %v236_v24 = vpop.permute.xlu0 %235 }
 0x424   : > { %239 = vst.msk [vmem:[#allocation2 - $0x4] sm:$0xf0] %vm238_vm5, %v236_v24 }
 0x425   : > { %v242_v25 = vpop.permute.xlu1 %241 }
 0x426   : > { %245 = vst.msk [vmem:[#allocation2] sm:$0xf] %vm244_vm6, %v242_v25 }
 0x429   : > { %v247_v26 = vpop.permute.xlu1 %246 }
 0x42a   : > { %250 = vst.msk [vmem:[#allocation2 - $0x4] sm:$0xf0] %vm249_vm7, %v247_v26 }
 0x42d   : > { %v375_v27 = vpop.permute.xlu1 %374  ;;  %v380_v28 = vpop.permute.xlu0 %379 }
 0x42e   : > { %377 = vst.msk [vmem:[#allocation2] sm:$0xf0] %vm238_vm5, %v375_v27 }
 0x42f   : > { %382 = vst.msk [vmem:[#allocation2 + $0x4] sm:$0xf] %vm244_vm6, %v380_v28 }
 0x431   : > { %v384_v29 = vpop.permute.xlu0 %383 }
 0x432   : > { %386 = vst.msk [vmem:[#allocation2] sm:$0xf0] %vm249_vm7, %v384_v29 }
 0x439   : > { %v663_v36 = vld [vmem:[#allocation2] sm:$0xff] }
 0x45c   : > { %v511_v30 = vpop.permute.xlu1 %510 }
 0x45d   : > { %513 = vst.msk [vmem:[#allocation2 + $0x4] sm:$0xf0] %vm238_vm5, %v511_v30 }
 0x460   : > { %v516_v31 = vpop.permute.xlu1 %515 }
 0x461   : > { %518 = vst.msk [vmem:[#allocation2 + $0x8] sm:$0xf] %vm244_vm6, %v516_v31 }
 0x464   : > { %v520_v32 = vpop.permute.xlu1 %519  ;;  %v647_v33 = vpop.permute.xlu0 %646 }
 0x465   : > { %522 = vst.msk [vmem:[#allocation2 + $0x4] sm:$0xf0] %vm249_vm7, %v520_v32 }
 0x466   : > { %649 = vst.msk [vmem:[#allocation2 + $0x8] sm:$0xf0] %vm238_vm5, %v647_v33 }
 0x468   : > { %v652_v34 = vpop.permute.xlu0 %651 }
 0x469   : > { %654 = vst.msk [vmem:[#allocation2 + $0xc] sm:$0xf] %vm244_vm6, %v652_v34 }
 0x46c   : > { %v656_v35 = vpop.permute.xlu0 %655 }
 0x46d   : > { %658 = vst.msk [vmem:[#allocation2 + $0x8] sm:$0xf0] %vm249_vm7, %v656_v35 }
 0x474   : > { %v664_v37 = vld [vmem:[#allocation2 + $0x8] sm:$0xff] }
 0x475   : > { %v665_v38 = vpack.c.bf16 %v664_v37, %v663_v36  ;;  %v669_v41 = vpop.permute.xlu1 %668 }
 0x477   : > { %878 = vmatprep.subr.msk.bf16.mxu1 %vm64_vm1, %v665_v38  ;;  %v703_v39 = vsel %vm64_vm1, %v665_v38, 0 }
 0x478   : > { %873 = vmatpush3.bf16.xpose.msra.mxu1 %v703_v39 }
 0x479   : > { %v679_v42 = vpop.permute.xlu1 %678 }
 0x47d   : > { %v674_v6 = vpop.permute.xlu0 %673  ;;  %v684_v46 = vpop.permute.xlu1 %683 }
 0x47f   : > { %875 = vmatmul.mubr.msk.bf16.vlgmr.msra.gmra.mrb[16].mxu1 %vm64_vm1, %v910_v40 }
 0x552   : > { %v876_v43 = vpop.f32.mrb[16].mxu1  ;;  %30 = sbr.rel (!%p28_p0) target bundleno = 3 (0x3), region = 49 }
 0x553   : > { %v748_v44 = vadd.f32 %v876_v43, %v679_v42  ;;  %v739_v45 = vpop.f32.mrb[17].mxu1 }
 0x554   : > { %v740_v47 = vadd.f32 %v739_v45, %v669_v41  ;;  %v877_v48 = vpop.f32.mrb[18].mxu1 }
 0x555   : > { %758 = vst.msk [vmem:[%s755_s30 + $0x10] sm:$0xff] %vm161_vm3, %v748_v44  ;;  %v751_v49 = vadd.f32 %v877_v48, %v684_v46  ;;  %v742_v50 = vpop.f32.mrb[19].mxu1 }
 0x556   : > { %756 = vst.msk [vmem:[%s755_s30] sm:$0xff] %vm161_vm3, %v740_v47  ;;  %v743_v51 = vadd.f32 %v742_v50, %v674_v6 }
 0x557   : > { %759 = vst.msk [vmem:[%s755_s30 + $0x18] sm:$0xff] %vm161_vm3, %v751_v49 }
 0x558   : > { %757 = vst.msk [vmem:[%s755_s30 + $0x8] sm:$0xff] %vm161_vm3, %v743_v51 }

</bundles_post_ra>
